<compile_context>
chip_gen: v5e
topology: v5e:2x2
jax: 0.10.0
libtpu: 0.0.40
codegen_flags: <defaults>
</compile_context>

<pallas_src>
import jax
import jax.numpy as jnp
from jax.experimental import pallas as pl
from jax.experimental.pallas import tpu as pltpu


def _make_fire_kernel(H, W):
    """Builds the Fire kernel for a fixed spatial size (H, W)."""
    HW = H * W

    def kernel(x_ref, wsq_ref, ssq_ref, bsq_ref,
               wexp_ref, sexp_ref, bexp_ref, out_ref):
        # ---- squeeze: 1x1 conv as (Csq, Cin) @ (Cin, HW) on the MXU,
        #      folded BN (f32 scale/bias) + ReLU ----
        s = jnp.dot(wsq_ref[...], x_ref[0],
                    preferred_element_type=jnp.float32)        # (Csq, HW) f32
        s = jnp.maximum(s * ssq_ref[...] + bsq_ref[...], 0.0)

        # ---- build the 9 shifted taps of s (zero-padded 3x3 conv) ----
        # Shifts along the flattened HW lane axis are lane rotations (XLU) with
        # boundary masks; no padded VMEM scratch and no per-tap matmul.
        lane = jax.lax.broadcasted_iota(jnp.int32, (1, HW), 1)
        col = lane % W
        not_left = col >= 1                  # input col w-1 >= 0
        not_right = col <= W - 2             # input col w+1 <  W
        not_top = lane >= W                  # input row h-1 >= 0
        not_bottom = lane < (H - 1) * W      # input row h+1 <  H

        taps = []
        for ky in range(3):
            for kx in range(3):
                d = (ky - 1) * W + (kx - 1)          # tap reads s[:, i + d]
                t = s if d == 0 else pltpu.roll(s, (-d) % HW, axis=1)
                cond = None
                if kx == 0:
                    cond = not_left
                elif kx == 2:
                    cond = not_right
                if ky == 0:
                    cond = not_top if cond is None else (cond & not_top)
                elif ky == 2:
                    cond = not_bottom if cond is None else (cond & not_bottom)
                if cond is not None:
                    t = jnp.where(cond, t, 0.0)
                taps.append(t)
        taps_all = jnp.concatenate(taps, axis=0).astype(wexp_ref.dtype)  # (9*Csq, HW)

        # ---- fused expand: ONE matmul produces [expand1x1 ; expand3x3] rows
        #      (e1 weight lives in the center-tap columns), folded BN + ReLU,
        #      stored directly in the concatenated channel layout ----
        e = jnp.dot(wexp_ref[...], taps_all,
                    preferred_element_type=jnp.float32)         # (Cout, HW) f32
        e = jnp.maximum(e * sexp_ref[...] + bexp_ref[...], 0.0)
        out_ref[0] = e.astype(out_ref.dtype)

    return kernel


def _fold_bn(conv_bias, bn_params, eps=1e-5):
    """Eval-mode BN folded into per-channel (scale, bias) of shape (C, 1)."""
    gamma, beta, mean, var = bn_params
    scale = gamma / jnp.sqrt(var + eps)
    bias = beta + scale * (conv_bias - mean)
    return scale.astype(jnp.float32)[:, None], bias.astype(jnp.float32)[:, None]


def fire_pallas(x_nchw, p, compute_dtype=jnp.bfloat16):
    N, Cin, H, W = x_nchw.shape
    HW = H * W

    # NCHW is already channels-major: a pure reshape gives the
    # channels-on-sublanes / HW-on-lanes layout (no transposes at all).
    x = x_nchw.reshape(N, Cin, HW).astype(compute_dtype)

    Csq = p['sq_w'].shape[0]
    Ce1 = p['e1_w'].shape[0]
    Ce3 = p['e3_w'].shape[0]
    Cout = Ce1 + Ce3

    # squeeze weight: (Csq, Cin)
    wsq = p['sq_w'][:, :, 0, 0].astype(compute_dtype)

    # Fused expand weight (Cout, 9*Csq), tap-major columns (ky*3 + kx)*Csq + c:
    #  rows [0, Ce1)      : expand1x1 weight in the center-tap columns, zeros elsewhere
    #  rows [Ce1, Cout)   : expand3x3 weight for all 9 taps
    we3 = jnp.transpose(p['e3_w'], (0, 2, 3, 1)).reshape(Ce3, 9 * Csq)
    we1 = jnp.zeros((Ce1, 9 * Csq), p['e1_w'].dtype)
    we1 = we1.at[:, 4 * Csq:5 * Csq].set(p['e1_w'][:, :, 0, 0])   # center tap (ky=1,kx=1)
    wexp = jnp.concatenate([we1, we3], axis=0).astype(compute_dtype)

    # Folded BN scale/bias, kept in f32; expand scale/bias concatenated in the
    # same [e1 ; e3] channel order as the fused weight.
    ssq, bsq = _fold_bn(p['sq_b'], p['sq_bn'])
    se1, be1 = _fold_bn(p['e1_b'], p['e1_bn'])
    se3, be3 = _fold_bn(p['e3_b'], p['e3_bn'])
    sexp = jnp.concatenate([se1, se3], axis=0)
    bexp = jnp.concatenate([be1, be3], axis=0)

    def const_spec(shape):
        # Weights / folded-BN constants: same (full-array) block for every grid
        # step.  They are a few KB here, so default buffering is harmless.
        return pl.BlockSpec(shape, lambda n, _nd=len(shape): (0,) * _nd)

    kernel = _make_fire_kernel(H, W)

    out = pl.pallas_call(
        kernel,
        out_shape=jax.ShapeDtypeStruct((N, Cout, HW), jnp.float32),
        grid=(N,),
        in_specs=[
            pl.BlockSpec((1, Cin, HW), lambda n: (n, 0, 0)),
            const_spec(wsq.shape),
            const_spec(ssq.shape), const_spec(bsq.shape),
            const_spec(wexp.shape),
            const_spec(sexp.shape), const_spec(bexp.shape),
        ],
        out_specs=pl.BlockSpec((1, Cout, HW), lambda n: (n, 0, 0)),
        compiler_params=pltpu.CompilerParams(
            dimension_semantics=("parallel",),
            vmem_limit_bytes=32 * 1024 * 1024,
        ),
    )(x, wsq, ssq, bsq, wexp, sexp, bexp)

    return out.reshape(N, Cout, H, W)   # still NCHW; reshape is free


def init_fire_params(key, inplanes, squeeze_planes, e1_planes, e3_planes):
    ks = jax.random.split(key, 9)

    def bn_params(k, c):
        k1, k2, k3, k4 = jax.random.split(k, 4)
        gamma = 0.5 + jax.random.uniform(k1, (c,), jnp.float32)
        beta = 0.1 * jax.random.normal(k2, (c,), jnp.float32)
        mean = 0.1 * jax.random.normal(k3, (c,), jnp.float32)
        var = 0.5 + jax.random.uniform(k4, (c,), jnp.float32)
        return gamma, beta, mean, var

    p = {}
    p['sq_w'] = 0.3 * jax.random.normal(ks[0], (squeeze_planes, inplanes, 1, 1), jnp.float32)
    p['sq_b'] = 0.1 * jax.random.normal(ks[1], (squeeze_planes,), jnp.float32)
    p['sq_bn'] = bn_params(ks[2], squeeze_planes)
    p['e1_w'] = 0.3 * jax.random.normal(ks[3], (e1_planes, squeeze_planes, 1, 1), jnp.float32)
    p['e1_b'] = 0.1 * jax.random.normal(ks[4], (e1_planes,), jnp.float32)
    p['e1_bn'] = bn_params(ks[5], e1_planes)
    p['e3_w'] = 0.3 * jax.random.normal(ks[6], (e3_planes, squeeze_planes, 3, 3), jnp.float32)
    p['e3_b'] = 0.1 * jax.random.normal(ks[7], (e3_planes,), jnp.float32)
    p['e3_bn'] = bn_params(ks[8], e3_planes)
    return p


def fire_reference(x, p, eps=1e-5):
    """Pure-JAX reference matching the PyTorch forward (eval-mode BN)."""
    def conv(v, w, b, pad):
        y = jax.lax.conv_general_dilated(
            v, w, (1, 1), [(pad, pad), (pad, pad)],
            dimension_numbers=('NCHW', 'OIHW', 'NCHW'))
        return y + b[None, :, None, None]

    def bn(v, bn_p):
        gamma, beta, mean, var = bn_p
        return gamma[None, :, None, None] * (v - mean[None, :, None, None]) \
            / jnp.sqrt(var[None, :, None, None] + eps) + beta[None, :, None, None]

    relu = lambda v: jnp.maximum(v, 0.0)
    s = relu(bn(conv(x, p['sq_w'], p['sq_b'], 0), p['sq_bn']))
    e1 = relu(bn(conv(s, p['e1_w'], p['e1_b'], 0), p['e1_bn']))
    e3 = relu(bn(conv(s, p['e3_w'], p['e3_b'], 1), p['e3_bn']))
    return jnp.concatenate([e1, e3], axis=1)


if __name__ == "__main__":
    key = jax.random.PRNGKey(0)
    kx, kp = jax.random.split(key)

    # Fire(inplanes=4, squeeze_planes=8, expand1x1_planes=8, expand3x3_planes=8)
    N, Cin, H, W = 2, 4, 16, 16
    Csq, Ce1, Ce3 = 8, 8, 8

    x = jax.random.normal(kx, (N, Cin, H, W), jnp.float32)
    params = init_fire_params(kp, Cin, Csq, Ce1, Ce3)
    ref = fire_reference(x, params)

    # Default (performance) path: bf16 matmul inputs, f32 accumulation.
    out = jax.block_until_ready(fire_pallas(x, params))
    assert out.shape == (N, Ce1 + Ce3, H, W), out.shape
    max_err_bf16 = float(jnp.max(jnp.abs(out - ref)))
    # Tolerance relaxed for bf16 inputs (accumulation stays f32).
    assert jnp.allclose(out, ref, atol=1.5e-1, rtol=1e-1), max_err_bf16

    # Exact-math check of the kernel (same code path, f32 inputs): tight tolerance.
    out_f32 = jax.block_until_ready(fire_pallas(x, params, compute_dtype=jnp.float32))
    max_err_f32 = float(jnp.max(jnp.abs(out_f32 - ref)))
    assert jnp.allclose(out_f32, ref, atol=1e-4, rtol=1e-4), max_err_f32

    print("KERNEL_OK")
</pallas_src>

<mosaic_0001>
module attributes {stable_mosaic.version = 11 : i64} {
  func.func @kernel(%arg0: i32, %arg1: memref<1x4x256xbf16, #tpu.memory_space<vmem>>, %arg2: memref<8x4xbf16, #tpu.memory_space<vmem>>, %arg3: memref<8x1xf32, #tpu.memory_space<vmem>>, %arg4: memref<8x1xf32, #tpu.memory_space<vmem>>, %arg5: memref<16x72xbf16, #tpu.memory_space<vmem>>, %arg6: memref<16x1xf32, #tpu.memory_space<vmem>>, %arg7: memref<16x1xf32, #tpu.memory_space<vmem>>, %arg8: memref<1x16x256xf32, #tpu.memory_space<vmem>>) attributes {dimension_semantics = [#tpu.dimension_semantics<parallel>], iteration_bounds = array<i64: 2>, scalar_prefetch = 0 : i64, scratch_operands = 0 : i64, tpu.core_type = #tpu.core_type<tc>, window_params = [{transform_indices = @transform_0, window_bounds = array<i64: 1, 4, 256>}, {pipeline_mode = #tpu.pipeline_mode<synchronous>, transform_indices = @transform_1, window_bounds = array<i64: 8, 4>}, {pipeline_mode = #tpu.pipeline_mode<synchronous>, transform_indices = @transform_2, window_bounds = array<i64: 8, 1>}, {pipeline_mode = #tpu.pipeline_mode<synchronous>, transform_indices = @transform_3, window_bounds = array<i64: 8, 1>}, {pipeline_mode = #tpu.pipeline_mode<synchronous>, transform_indices = @transform_4, window_bounds = array<i64: 16, 72>}, {pipeline_mode = #tpu.pipeline_mode<synchronous>, transform_indices = @transform_5, window_bounds = array<i64: 16, 1>}, {pipeline_mode = #tpu.pipeline_mode<synchronous>, transform_indices = @transform_6, window_bounds = array<i64: 16, 1>}, {transform_indices = @transform_7, window_bounds = array<i64: 1, 16, 256>}]} {
    %c0 = arith.constant 0 : index
    %c0_0 = arith.constant 0 : index
    %0 = vector.load %arg2[%c0, %c0_0] : memref<8x4xbf16, #tpu.memory_space<vmem>>, vector<8x4xbf16>
    %c0_1 = arith.constant 0 : index
    %c0_2 = arith.constant 0 : index
    %c0_3 = arith.constant 0 : index
    %1 = vector.load %arg1[%c0_1, %c0_2, %c0_3] : memref<1x4x256xbf16, #tpu.memory_space<vmem>>, vector<1x4x256xbf16>
    %2 = vector.shape_cast %1 : vector<1x4x256xbf16> to vector<4x256xbf16>
    %cst = arith.constant dense<0.000000e+00> : vector<8x256xf32>
    %3 = tpu.matmul %0, %2, %cst {dimension_numbers = #tpu.dot_dimension_numbers<[1], [0], [0], [1], [0, 0, 1, 1], [], []>} : vector<8x4xbf16>, vector<4x256xbf16>, vector<8x256xf32> -> vector<8x256xf32>
    %c0_4 = arith.constant 0 : index
    %c0_5 = arith.constant 0 : index
    %4 = vector.load %arg3[%c0_4, %c0_5] : memref<8x1xf32, #tpu.memory_space<vmem>>, vector<8x1xf32>
    %5 = vector.broadcast %4 : vector<8x1xf32> to vector<8x256xf32>
    %6 = arith.mulf %3, %5 : vector<8x256xf32>
    %c0_6 = arith.constant 0 : index
    %c0_7 = arith.constant 0 : index
    %7 = vector.load %arg4[%c0_6, %c0_7] : memref<8x1xf32, #tpu.memory_space<vmem>>, vector<8x1xf32>
    %8 = vector.broadcast %7 : vector<8x1xf32> to vector<8x256xf32>
    %9 = arith.addf %6, %8 : vector<8x256xf32>
    %cst_8 = arith.constant 0.000000e+00 : f32
    %10 = vector.broadcast %cst_8 : f32 to vector<8x256xf32>
    %11 = arith.maximumf %9, %10 : vector<8x256xf32>
    %12 = tpu.iota {dimensions = array<i32: 1>} : vector<1x256xi32>
    %c16_i32 = arith.constant 16 : i32
    %c0_i32 = arith.constant 0 : i32
    %13 = arith.cmpi eq, %c16_i32, %c0_i32 : i32
    %c1_i32 = arith.constant 1 : i32
    %14 = arith.select %13, %c1_i32, %c16_i32 : i32
    %15 = vector.broadcast %14 : i32 to vector<1x256xi32>
    %16 = arith.remsi %12, %15 : vector<1x256xi32>
    %c0_i32_9 = arith.constant 0 : i32
    %17 = vector.broadcast %c0_i32_9 : i32 to vector<1x256xi32>
    %18 = arith.cmpi ne, %16, %17 : vector<1x256xi32>
    %c0_i32_10 = arith.constant 0 : i32
    %19 = vector.broadcast %c0_i32_10 : i32 to vector<1x256xi32>
    %20 = arith.cmpi slt, %16, %19 : vector<1x256xi32>
    %c0_i32_11 = arith.constant 0 : i32
    %21 = arith.cmpi slt, %14, %c0_i32_11 : i32
    %22 = vector.broadcast %21 : i1 to vector<1x256xi1>
    %23 = vector.broadcast %22 : vector<1x256xi1> to vector<1x256xi1>
    %24 = arith.xori %20, %23 : vector<1x256xi1>
    %25 = arith.andi %24, %18 : vector<1x256xi1>
    %26 = vector.broadcast %14 : i32 to vector<1x256xi32>
    %27 = arith.addi %16, %26 : vector<1x256xi32>
    %28 = arith.select %25, %27, %16 : vector<1x256xi1>, vector<1x256xi32>
    %c1_i32_12 = arith.constant 1 : i32
    %29 = vector.broadcast %c1_i32_12 : i32 to vector<1x256xi32>
    %30 = arith.cmpi sge, %28, %29 : vector<1x256xi32>
    %c14_i32 = arith.constant 14 : i32
    %31 = vector.broadcast %c14_i32 : i32 to vector<1x256xi32>
    %32 = arith.cmpi sle, %28, %31 : vector<1x256xi32>
    %c16_i32_13 = arith.constant 16 : i32
    %33 = vector.broadcast %c16_i32_13 : i32 to vector<1x256xi32>
    %34 = arith.cmpi sge, %12, %33 : vector<1x256xi32>
    %c240_i32 = arith.constant 240 : i32
    %35 = vector.broadcast %c240_i32 : i32 to vector<1x256xi32>
    %36 = arith.cmpi slt, %12, %35 : vector<1x256xi32>
    %c17_i32 = arith.constant 17 : i32
    %37 = tpu.dynamic_rotate %11 by %c17_i32 dim 1 : vector<8x256xf32>, i32 -> vector<8x256xf32>
    %38 = arith.andi %30, %34 : vector<1x256xi1>
    %cst_14 = arith.constant 0.000000e+00 : f32
    %39 = vector.shape_cast %38 : vector<1x256xi1> to vector<1x256xi1>
    %40 = vector.broadcast %39 : vector<1x256xi1> to vector<8x256xi1>
    %41 = vector.broadcast %cst_14 : f32 to vector<8x256xf32>
    %42 = arith.select %40, %37, %41 : vector<8x256xi1>, vector<8x256xf32>
    %c16_i32_15 = arith.constant 16 : i32
    %43 = tpu.dynamic_rotate %11 by %c16_i32_15 dim 1 : vector<8x256xf32>, i32 -> vector<8x256xf32>
    %cst_16 = arith.constant 0.000000e+00 : f32
    %44 = vector.shape_cast %34 : vector<1x256xi1> to vector<1x256xi1>
    %45 = vector.broadcast %44 : vector<1x256xi1> to vector<8x256xi1>
    %46 = vector.broadcast %cst_16 : f32 to vector<8x256xf32>
    %47 = arith.select %45, %43, %46 : vector<8x256xi1>, vector<8x256xf32>
    %c15_i32 = arith.constant 15 : i32
    %48 = tpu.dynamic_rotate %11 by %c15_i32 dim 1 : vector<8x256xf32>, i32 -> vector<8x256xf32>
    %49 = arith.andi %32, %34 : vector<1x256xi1>
    %cst_17 = arith.constant 0.000000e+00 : f32
    %50 = vector.shape_cast %49 : vector<1x256xi1> to vector<1x256xi1>
    %51 = vector.broadcast %50 : vector<1x256xi1> to vector<8x256xi1>
    %52 = vector.broadcast %cst_17 : f32 to vector<8x256xf32>
    %53 = arith.select %51, %48, %52 : vector<8x256xi1>, vector<8x256xf32>
    %c1_i32_18 = arith.constant 1 : i32
    %54 = tpu.dynamic_rotate %11 by %c1_i32_18 dim 1 : vector<8x256xf32>, i32 -> vector<8x256xf32>
    %cst_19 = arith.constant 0.000000e+00 : f32
    %55 = vector.shape_cast %30 : vector<1x256xi1> to vector<1x256xi1>
    %56 = vector.broadcast %55 : vector<1x256xi1> to vector<8x256xi1>
    %57 = vector.broadcast %cst_19 : f32 to vector<8x256xf32>
    %58 = arith.select %56, %54, %57 : vector<8x256xi1>, vector<8x256xf32>
    %c255_i32 = arith.constant 255 : i32
    %59 = tpu.dynamic_rotate %11 by %c255_i32 dim 1 : vector<8x256xf32>, i32 -> vector<8x256xf32>
    %cst_20 = arith.constant 0.000000e+00 : f32
    %60 = vector.shape_cast %32 : vector<1x256xi1> to vector<1x256xi1>
    %61 = vector.broadcast %60 : vector<1x256xi1> to vector<8x256xi1>
    %62 = vector.broadcast %cst_20 : f32 to vector<8x256xf32>
    %63 = arith.select %61, %59, %62 : vector<8x256xi1>, vector<8x256xf32>
    %c241_i32 = arith.constant 241 : i32
    %64 = tpu.dynamic_rotate %11 by %c241_i32 dim 1 : vector<8x256xf32>, i32 -> vector<8x256xf32>
    %65 = arith.andi %30, %36 : vector<1x256xi1>
    %cst_21 = arith.constant 0.000000e+00 : f32
    %66 = vector.shape_cast %65 : vector<1x256xi1> to vector<1x256xi1>
    %67 = vector.broadcast %66 : vector<1x256xi1> to vector<8x256xi1>
    %68 = vector.broadcast %cst_21 : f32 to vector<8x256xf32>
    %69 = arith.select %67, %64, %68 : vector<8x256xi1>, vector<8x256xf32>
    %c240_i32_22 = arith.constant 240 : i32
    %70 = tpu.dynamic_rotate %11 by %c240_i32_22 dim 1 : vector<8x256xf32>, i32 -> vector<8x256xf32>
    %cst_23 = arith.constant 0.000000e+00 : f32
    %71 = vector.shape_cast %36 : vector<1x256xi1> to vector<1x256xi1>
    %72 = vector.broadcast %71 : vector<1x256xi1> to vector<8x256xi1>
    %73 = vector.broadcast %cst_23 : f32 to vector<8x256xf32>
    %74 = arith.select %72, %70, %73 : vector<8x256xi1>, vector<8x256xf32>
    %c239_i32 = arith.constant 239 : i32
    %75 = tpu.dynamic_rotate %11 by %c239_i32 dim 1 : vector<8x256xf32>, i32 -> vector<8x256xf32>
    %76 = arith.andi %32, %36 : vector<1x256xi1>
    %cst_24 = arith.constant 0.000000e+00 : f32
    %77 = vector.shape_cast %76 : vector<1x256xi1> to vector<1x256xi1>
    %78 = vector.broadcast %77 : vector<1x256xi1> to vector<8x256xi1>
    %79 = vector.broadcast %cst_24 : f32 to vector<8x256xf32>
    %80 = arith.select %78, %75, %79 : vector<8x256xi1>, vector<8x256xf32>
    %81 = tpu.concatenate %42, %47, %53, %58, %11, %63, %69, %74, %80 in 0 : vector<8x256xf32>, vector<8x256xf32>, vector<8x256xf32>, vector<8x256xf32>, vector<8x256xf32>, vector<8x256xf32>, vector<8x256xf32>, vector<8x256xf32>, vector<8x256xf32> -> vector<72x256xf32>
    %82 = arith.truncf %81 : vector<72x256xf32> to vector<72x256xbf16>
    %c0_25 = arith.constant 0 : index
    %c0_26 = arith.constant 0 : index
    %83 = vector.load %arg5[%c0_25, %c0_26] : memref<16x72xbf16, #tpu.memory_space<vmem>>, vector<16x72xbf16>
    %cst_27 = arith.constant dense<0.000000e+00> : vector<16x256xf32>
    %84 = tpu.matmul %83, %82, %cst_27 {dimension_numbers = #tpu.dot_dimension_numbers<[1], [0], [0], [1], [0, 0, 1, 1], [], []>} : vector<16x72xbf16>, vector<72x256xbf16>, vector<16x256xf32> -> vector<16x256xf32>
    %c0_28 = arith.constant 0 : index
    %c0_29 = arith.constant 0 : index
    %85 = vector.load %arg6[%c0_28, %c0_29] : memref<16x1xf32, #tpu.memory_space<vmem>>, vector<16x1xf32>
    %86 = vector.broadcast %85 : vector<16x1xf32> to vector<16x256xf32>
    %87 = arith.mulf %84, %86 : vector<16x256xf32>
    %c0_30 = arith.constant 0 : index
    %c0_31 = arith.constant 0 : index
    %88 = vector.load %arg7[%c0_30, %c0_31] : memref<16x1xf32, #tpu.memory_space<vmem>>, vector<16x1xf32>
    %89 = vector.broadcast %88 : vector<16x1xf32> to vector<16x256xf32>
    %90 = arith.addf %87, %89 : vector<16x256xf32>
    %cst_32 = arith.constant 0.000000e+00 : f32
    %91 = vector.broadcast %cst_32 : f32 to vector<16x256xf32>
    %92 = arith.maximumf %90, %91 : vector<16x256xf32>
    %c0_33 = arith.constant 0 : index
    %c0_34 = arith.constant 0 : index
    %c0_35 = arith.constant 0 : index
    %93 = vector.load %arg8[%c0_33, %c0_34, %c0_35] : memref<1x16x256xf32, #tpu.memory_space<vmem>>, vector<1x16x256xf32>
    %94 = vector.shape_cast %93 : vector<1x16x256xf32> to vector<16x256xf32>
    %95 = vector.shape_cast %92 : vector<16x256xf32> to vector<1x16x256xf32>
    tpu.vector_store %arg8[%c0_33, %c0_34, %c0_35], %95 {strides = array<i32>} : memref<1x16x256xf32, #tpu.memory_space<vmem>>, vector<1x16x256xf32>,
    return
  }
  func.func @transform_0(%arg0: i32) -> (i32, i32, i32) {
    %c0_i32 = arith.constant 0 : i32
    %c0_i32_0 = arith.constant 0 : i32
    %c0_i32_1 = arith.constant 0 : i32
    return %arg0, %c0_i32, %c0_i32_0 : i32, i32, i32
  }
  func.func @transform_1(%arg0: i32) -> (i32, i32) {
    %c0_i32 = arith.constant 0 : i32
    %c0_i32_0 = arith.constant 0 : i32
    %c0_i32_1 = arith.constant 0 : i32
    return %c0_i32, %c0_i32_0 : i32, i32
  }
  func.func @transform_2(%arg0: i32) -> (i32, i32) {
    %c0_i32 = arith.constant 0 : i32
    %c0_i32_0 = arith.constant 0 : i32
    %c0_i32_1 = arith.constant 0 : i32
    return %c0_i32, %c0_i32_0 : i32, i32
  }
  func.func @transform_3(%arg0: i32) -> (i32, i32) {
    %c0_i32 = arith.constant 0 : i32
    %c0_i32_0 = arith.constant 0 : i32
    %c0_i32_1 = arith.constant 0 : i32
    return %c0_i32, %c0_i32_0 : i32, i32
  }
  func.func @transform_4(%arg0: i32) -> (i32, i32) {
    %c0_i32 = arith.constant 0 : i32
    %c0_i32_0 = arith.constant 0 : i32
    %c0_i32_1 = arith.constant 0 : i32
    return %c0_i32, %c0_i32_0 : i32, i32
  }
  func.func @transform_5(%arg0: i32) -> (i32, i32) {
    %c0_i32 = arith.constant 0 : i32
    %c0_i32_0 = arith.constant 0 : i32
    %c0_i32_1 = arith.constant 0 : i32
    return %c0_i32, %c0_i32_0 : i32, i32
  }
  func.func @transform_6(%arg0: i32) -> (i32, i32) {
    %c0_i32 = arith.constant 0 : i32
    %c0_i32_0 = arith.constant 0 : i32
    %c0_i32_1 = arith.constant 0 : i32
    return %c0_i32, %c0_i32_0 : i32, i32
  }
  func.func @transform_7(%arg0: i32) -> (i32, i32, i32) {
    %c0_i32 = arith.constant 0 : i32
    %c0_i32_0 = arith.constant 0 : i32
    %c0_i32_1 = arith.constant 0 : i32
    return %arg0, %c0_i32, %c0_i32_0 : i32, i32, i32
  }
}

</mosaic_0001>

<bundles_post_ra>
// kernel: tpu_custom_call.1
= control target key start
LH: loop header
LB: loop body
LE: loop exit
PB: predicated region body
PF: predicated region fallthrough
CT: control target
= control target key end

     0   :  { %12 = vsyncpa [#allocation3], 0  ;;  %s1133_s0 = inlined_call_operand.vmem [shape: bf16[2,4,256], index: 0, kind: input, shape index: {}]   ;;  %s1134_s1 = inlined_call_operand.vmem [shape: bf16[8,4], index: 1, kind: input, shape index: {}]   ;;  %s1135_s2 = inlined_call_operand.vmem [shape: f32[8,1], index: 2, kind: input, shape index: {}]   ;;  %s1136_s3 = inlined_call_operand.vmem [shape: f32[8,1], index: 3, kind: input, shape index: {}]   ;;  %s1137_s4 = inlined_call_operand.vmem [shape: bf16[16,72], index: 4, kind: input, shape index: {}]   ;;  %s1138_s5 = inlined_call_operand.vmem [shape: f32[16,1], index: 5, kind: input, shape index: {}]   ;;  %s1139_s6 = inlined_call_operand.vmem [shape: f32[16,1], index: 6, kind: input, shape index: {}]   ;;  %s1140_s7 = inlined_call_operand.hbm [shape: f32[2,16,256], index: 7, kind: output, shape index: {}]  }
   0x1   :  { %14 = vsyncpa [#allocation3 + $0x1], 0  ;;  %s913_s24 = smov 0   ;;  %s915_s25 = smov 0  }
   0x2   :  { %s917_s26 = smov 0   ;;  %s919_s27 = smov 0  }
   0x3 LB: > { %s934_s28 = sadd.s32 4294967295, %s860_s27   ;;  %s658_s29 = sadd.s32 4294967294, %s860_s27   ;;  %s860_s27 = sphi %s919_s27, %s1158_s27   ;;  %s856_s26 = sphi %s917_s26, %s1157_s26   ;;  %s852_s25 = sphi %s915_s25, %s1156_s25   ;;  %s848_s24 = sphi %s913_s24, %s1155_s24  }
   0x4   : > { %s938_s30 = sadd.s32 1, %s860_s27   ;;  %s179_s8 = sadd.s32 1, %s856_s26 }
   0x5   : > { %s176_s9 = ssub.s32 %s860_s27, %s938_s30  ;;  %p189_p0 = scmp.ne.s32.totalorder %s856_s26, %s852_s25 }
   0x6   : > { %p177_p1 = scmp.eq.s32.totalorder %s176_s9, 0  ;;  %p190_p2 = scmp.eq.s32.totalorder %s934_s28, 1 }
   0x7   : > { %p195_p3 = scmp.ne.s32.totalorder %s852_s25, %s848_s24  ;;  %p196_p4 = scmp.eq.s32.totalorder %s658_s29, 1 }
   0x8   : > { %s949_s10 = scalar_select %p177_p1, %s856_s26, %s179_s8  }
   0x9   : > { %p951_p5 = por %p190_p2, %p189_p0  ;;  %p955_p6 = por %p196_p4, %p195_p3 }
   0xa   : > { %p661_p7 = scmp.ge.s32.totalorder %s860_s27, 1  ;;  %p240_p8 = scmp.lt.s32.totalorder %s860_s27, 3 }
   0xc   : > { %p241_p9 = pnand %p661_p7, %p240_p8 }
   0xd   : > { %p272_p10 = scmp.lt.s32.totalorder (!%p241_p9), %s934_s28, 1  ;;  %s863_s29 = smov (!%p241_p9), 15  }
   0xe   : > { %244 = sbr.rel (%p241_p9) target bundleno = 465 (0x1d1), region = 48  ;;  %s864_s8 = smov (!%p241_p9), 112  }
   0xf   : > { %s865_s9 = smov (!%p241_p9), 111   ;;  %s866_s13 = smov (!%p241_p9), 16  }
  0x10   : > { %s867_s14 = smov (!%p241_p9), 127   ;;  %s869_s18 = smov (!%p241_p9), 17  }
  0x11   : > { %s704_s17 = sshll.u32 (!%p241_p9), %s934_s28, 5 }
  0x12   : > { %s592_s21 = scalar_lea.hbm (!%p241_p9), %s1140_s7, %s704_s17 }
  0x13   : > { %v319_v0 = vld [vmem:[%s1135_s2] sm:$0xff]  ;;  %v862_v1 = vmov 0   ;;  %s273_s15 = scalar_select %p272_p10, %s934_s28, 1  ;;  %vm288_vm0 = vcmask 1041408   ;;  %vm284_vm1 = vcmask 31744   ;;  %v337_v23 = vlaneseq  ;;  %v541_v30 = vld [vmem:[%s1138_s5 + $0x8] sm:$0xff] }
  0x14   : > { %755 = vset.pattern.permute.xlu0 %v862_v1  ;;  %796 = vset.pattern.permute.xlu1 %v862_v1  ;;  %v327_v3 = vld [vmem:[%s1136_s3] sm:$0xff]  ;;  %v557_v38 = vld [vmem:[%s1139_s6 + $0x8] sm:$0xff]  ;;  %vm505_vm7 = vcmask 1043456   ;;  %vm871_vm13 = vmmov 1   ;;  %s595_s23 = sshll.u32 %s592_s21, 4  ;;  %s596_s23 = int_to_ptr.hbm [resolvable:$true] %s595_s23 }
  0x15   : > { %322 = vperm.xlu0 %755, %v319_v0   ;;  %797 = vset.pattern.permute.xlu2 %v862_v1  ;;  %s702_s16 = sshll.u32 %s273_s15, 2  ;;  %v278_v8 = vld [vmem:[%s1134_s1] sm:$0xf]  ;;  %s868_s15 = smov 113   ;;  %v989_v24 = vand.u32 127, %v337_v23 }
  0x16   : > { %s276_s19 = scalar_lea.vmem %s1133_s0, %s702_s16  ;;  %v556_v22 = vld [vmem:[%s1139_s6] sm:$0xff] }
  0x17   : > { %v279_v2 = vld [vmem:[%s276_s19] sm:$0xf]  ;;  %s870_s19 = smov 1   ;;  %v339_v25 = vadd.s32 128, %v989_v24  ;;  %v344_v28 = vand.u32 15, %v989_v24  ;;  %vm473_vm4 = vcmp.lt.s32.totalorder %v989_v24, 111 }
  0x18   : > { %281 = vst [vmem:[#allocation1] ss:$4 sm:$0xff] %v279_v2  ;;  %v540_v29 = vld [vmem:[%s1138_s5] sm:$0xff]  ;;  %vm460_vm9 = vcmp.lt.s32.totalorder %v989_v24, 112  ;;  %vm445_vm11 = vcmp.lt.s32.totalorder %v989_v24, 113  ;;  %vm432_vm15 = vcmp.lt.s32.totalorder %v989_v24, 127 }
  0x19   : > { %v351_v26 = vand.u32 15, %v339_v25  ;;  %vm371_vm3 = vcmp.lt.s32.totalorder %v339_v25, 240  ;;  %vm1004_vm5 = vcmp.le.s32.totalorder %v344_v28, 14  ;;  %vm1023_vm10 = vcmp.ge.s32.totalorder %v344_v28, 1  ;;  %v703_v28 = vld [vmem:[%s1137_s4] sm:$0xff] }
  0x1a   : > { %vm671_vm14 = vmpackc.low %vm871_vm13, %vm1023_vm10 }
  0x1b   : > { %vm999_vm2 = vcmp.le.s32.totalorder %v351_v26, 14  ;;  %vm1018_vm8 = vcmp.ge.s32.totalorder %v351_v26, 1 }
  0x1c   : > { %vm477_vm6 = vmand %vm999_vm2, %vm371_vm3 }
  0x1d   : > { %330 = vperm.xlu0 %755, %v327_v3   ;;  %vm449_vm12 = vmand %vm1018_vm8, %vm371_vm3 }
  0x1f   : > { %v282_v4 = vld.sshfl [vmem:[#allocation1] sm:$0xff pattern:$0x73625140]  ;;  %v283_v5 = vld.sshfl [vmem:[#allocation1 + $0x8] sm:$0xff pattern:$0x73625140] }
  0x20   : > { %v289_v6 = vsel %vm288_vm0, %v282_v4, 0  ;;  %v291_v7 = vsel %vm288_vm0, %v283_v5, 0  ;;  %vm684_vm0 = vmpackc.low %vm371_vm3, %vm449_vm12  ;;  %vm391_vm12 = vcmp.lt.s32.totalorder %v989_v24, 16 }
  0x21   : > { %300 = vmatpush.bf16.msra.mxu0 %v289_v6  ;;  %313 = vmatpush.bf16.msra.mxu1 %v291_v7 }
  0x24   : > { %665 = vmatmul.msk.bf16.vlgmr.msra.gmra.mxu0 %vm284_vm1, %v278_v8  ;;  %666 = vmatmul.msk.bf16.vlgmr.msra.gmra.mxu1 %vm284_vm1, %v278_v8  ;;  %vm368_vm1 = vcmp.ge.s32.totalorder %v989_v24, 16 }
  0x25   : > { %vm1052_vm3 = vmand %vm1004_vm5, %vm368_vm1 }
  0x87   : > { %v323_v9 = vpop.permute.xlu0 %322 }
  0x8f   : > { %v331_v14 = vpop.permute.xlu0 %330 }
  0xa1   : > { %v302_v10 = vpop.f32.mrf.mxu0  ;;  %v315_v11 = vpop.f32.mrf.mxu1 }
  0xa2   : > { %v325_v12 = vmul.f32 %v323_v9, %v302_v10  ;;  %v326_v13 = vmul.f32 %v323_v9, %v315_v11 }
  0xa4   : > { %v975_v15 = vadd.f32 %v331_v14, %v325_v12  ;;  %v977_v16 = vadd.f32 %v331_v14, %v326_v13 }
  0xa6   : > { %v335_v17 = vmax.f32 %v975_v15, 0.0  ;;  %v336_v18 = vmax.f32 %v977_v16, 0.0 }
  0xa8   : > { %v776_v19 = vpack.i.bf16 %v336_v18, %v335_v17 }
  0xa9   : > { %v304_v20 = vpop.f32.mrf.mxu0  ;;  %v317_v21 = vpop.f32.mrf.mxu1 }
  0xaa   : > { %777 = vrot.lane.b32.xlu0 %v776_v19, %s863_s29  ;;  %767 = vrot.lane.b32.xlu2 %v776_v19, %s864_s8  ;;  %s812_s29 = sshra.s32 %s596_s23, 4  ;;  %s813_s29 = int_to_ptr.hbm [resolvable:$true] %s812_s29 }
  0xab   : > { %757 = vrot.lane.b32.xlu1 %v776_v19, %s865_s9  ;;  %s814_s8 = scalar_lea.hbm %s813_s29, 32  ;;  %p819_p0 = scmp.lt.s32.totalorder %s813_s29, %s1140_s7 }
  0xac   : > { %p815_p11 = scmp.ne.s32.totalorder %s813_s29, %s814_s8 }
  0xae   : > { %p816_p12 = pnand %p815_p11, %p951_p5 }
  0xb0   : > { %p817_p13 = pneg %p816_p12 }
  0xb2   : > { %792 = vrot.lane.b32.xlu0 %v776_v19, %s866_s13  ;;  %772 = vrot.lane.b32.xlu2 %v776_v19, %s867_s14 }
  0xb3   : > { %762 = vrot.lane.b32.xlu1 %v776_v19, %s868_s15  ;;  %s269_s15 = sand.u32 1, %s852_s25  }
  0xb4   : > { %s662_s16 = sshll.u32 %s269_s15, 5  ;;  %s581_s28 = scalar_lea.sflag [#allocation3], %s269_s15 }
  0xba   : > { %560 = vperm.xlu0 %755, %v556_v22   ;;  %787 = vrot.lane.b32.xlu2 %v776_v19, %s869_s18  ;;  %s271_s18 = scalar_lea.vmem [#allocation2], %s662_s16  ;;  %s818_s16 = scalar_lea.hbm %s1140_s7, 64 }
  0xbb   : > { %782 = vrot.lane.b32.xlu1 %v776_v19, %s870_s19  ;;  %s593_s22 = sshll.u32 %s271_s18, 4  ;;  %p820_p1 = scmp.lt.s32.totalorder %s818_s16, %s814_s8  ;;  %s594_s22 = int_to_ptr.vmem [resolvable:$true] %s593_s22 }
  0xbd   : > { %p821_p2 = por %p820_p1, %p819_p0 }
  0xbf   : > { %p822_p3 = pnand %p821_p2, %p817_p13 }
  0xc2   : > { %549 = vperm.xlu2 %797, %v541_v30  }
  0xc3   : > { %544 = vperm.xlu1 %796, %v540_v29  }
  0xcb   : > { %565 = vperm.xlu1 %796, %v557_v38  }
 0x104   : > { %v768_v27 = vpop.permute.xlu2 %767 }
 0x105   : > { %v770_v46 = vunpack.i.h.bf16 %v768_v27  ;;  %v769_v47 = vunpack.i.l.bf16 %v768_v27 }
 0x107   : > { %v461_v56 = vsel %vm460_vm9, %v769_v47, %v770_v46  ;;  %v462_v59 = vsel %vm460_vm9, %v770_v46, %v769_v47  ;;  %vm677_vm9 = vmpackc.low %vm1023_vm10, %vm1052_vm3 }
 0x10c   : > { %v773_v42 = vpop.permute.xlu2 %772 }
 0x10d   : > { %v775_v52 = vunpack.i.h.bf16 %v773_v42  ;;  %v774_v53 = vunpack.i.l.bf16 %v773_v42 }
 0x10f   : > { %v433_v62 = vsel %vm432_vm15, %v774_v53, %v775_v52  ;;  %v434_v0 = vsel %vm432_vm15, %v775_v52, %v774_v53  ;;  %vm376_vm15 = vcmp.lt.s32.totalorder %v989_v24, 17 }
 0x110   : > { %v675_v7 = vpack.c.bf16 %v433_v62, %v335_v17  ;;  %v688_v8 = vpack.c.bf16 %v434_v0, %v336_v18 }
 0x114   : > { %v788_v3 = vpop.permute.xlu2 %787 }
 0x115   : > { %v790_v13 = vunpack.i.h.bf16 %v788_v3  ;;  %v789_v14 = vunpack.i.l.bf16 %v788_v3 }
 0x117   : > { %v378_v23 = vsel %vm376_vm15, %v790_v13, %v789_v14  ;;  %v377_v25 = vsel %vm376_vm15, %v789_v14, %v790_v13 }
 0x11c   : > { %v1014_v39 = vpop.permute.xlu0 %777  ;;  %v550_v38 = vpop.permute.xlu2 %549 }
 0x11d   : > { %v758_v32 = vpop.permute.xlu1 %757  ;;  %v780_v4 = vunpack.i.h.bf16 %v1014_v39  ;;  %v779_v5 = vunpack.i.l.bf16 %v1014_v39 }
 0x11e   : > { %v760_v33 = vunpack.i.h.bf16 %v758_v32  ;;  %v759_v34 = vunpack.i.l.bf16 %v758_v32 }
 0x120   : > { %v474_v36 = vsel %vm473_vm4, %v759_v34, %v760_v33  ;;  %v475_v37 = vsel %vm473_vm4, %v760_v33, %v759_v34  ;;  %vm1044_vm4 = vmpackc.low %vm1004_vm5, %vm871_vm13 }
 0x121   : > { %v482_v40 = vsel %vm1004_vm5, %v474_v36, 0.0  ;;  %v483_v41 = vsel %vm477_vm6, %v475_v37, 0.0  ;;  %vm687_vm6 = vmpackc.low %vm999_vm2, %vm871_vm13  ;;  %vm404_vm5 = vcmp.lt.s32.totalorder %v989_v24, 15 }
 0x122   : > { %v492_v43 = vpack.c.bf16 %v482_v40, %v482_v40  ;;  %v493_v44 = vpack.c.bf16 %v483_v41, %v483_v41  ;;  %v406_v15 = vsel %vm404_vm5, %v780_v4, %v779_v5  ;;  %v405_v17 = vsel %vm404_vm5, %v779_v5, %v780_v4 }
 0x124   : > { %v507_v48 = vsel %vm505_vm7, %v492_v43, 0  ;;  %v510_v49 = vsel %vm505_vm7, %v493_v44, 0  ;;  %v793_v1 = vpop.permute.xlu0 %792  ;;  %vm419_vm7 = vcmp.lt.s32.totalorder %v989_v24, 1 }
 0x125   : > { %v763_v51 = vpop.permute.xlu1 %762  ;;  %515 = vmatpush.bf16.msra.mxu2 %v507_v48  ;;  %529 = vmatpush.bf16.msra.mxu3 %v510_v49  ;;  %v795_v9 = vunpack.i.h.bf16 %v793_v1  ;;  %v794_v10 = vunpack.i.l.bf16 %v793_v1 }
 0x126   : > { %v765_v54 = vunpack.i.h.bf16 %v763_v51  ;;  %v764_v55 = vunpack.i.l.bf16 %v763_v51 }
 0x127   : > { %v393_v21 = vsel %vm391_vm12, %v795_v9, %v794_v10  ;;  %v392_v22 = vsel %vm391_vm12, %v794_v10, %v795_v9 }
 0x128   : > { %v446_v57 = vsel %vm445_vm11, %v764_v55, %v765_v54  ;;  %v447_v58 = vsel %vm445_vm11, %v765_v54, %v764_v55  ;;  %vm690_vm11 = vmpackc.low %vm1018_vm8, %vm999_vm2  ;;  %v681_v26 = vpack.c.bf16 %v393_v21, %v378_v23  ;;  %v694_v27 = vpack.c.bf16 %v392_v22, %v377_v25 }
 0x129   : > { %v672_v60 = vpack.c.bf16 %v461_v56, %v446_v57  ;;  %v685_v61 = vpack.c.bf16 %v462_v59, %v447_v58 }
 0x12b   : > { %673 = vmatpush.bf16.msk.msra.mxu2 %vm671_vm14, %v672_v60  ;;  %686 = vmatpush.bf16.msk.msra.mxu3 %vm684_vm0, %v685_v61  ;;  %vm379_vm14 = vmand %vm1023_vm10, %vm368_vm1  ;;  %vm501_vm10 = vcmask 588800  }
 0x12c   : > { %vm680_vm2 = vmpackc.low %vm368_vm1, %vm379_vm14  ;;  %v561_v33 = vpop.permute.xlu0 %560 }
 0x12d   : > { %v783_v6 = vpop.permute.xlu1 %782  ;;  %vm693_vm0 = vmpackc.low %vm871_vm13, %vm1018_vm8 }
 0x12e   : > { %v785_v11 = vunpack.i.h.bf16 %v783_v6  ;;  %v784_v12 = vunpack.i.l.bf16 %v783_v6 }
 0x12f   : > { %676 = vmatpush.bf16.msk.msra.mxu2 %vm1044_vm4, %v675_v7  ;;  %689 = vmatpush.bf16.msk.msra.mxu3 %vm687_vm6, %v688_v8 }
 0x130   : > { %v421_v16 = vsel %vm419_vm7, %v785_v11, %v784_v12  ;;  %v420_v18 = vsel %vm419_vm7, %v784_v12, %v785_v11 }
 0x131   : > { %v678_v19 = vpack.c.bf16 %v421_v16, %v406_v15  ;;  %v691_v20 = vpack.c.bf16 %v420_v18, %v405_v17 }
 0x133   : > { %679 = vmatpush.bf16.msk.msra.mxu2 %vm677_vm9, %v678_v19  ;;  %692 = vmatpush.bf16.msk.msra.mxu3 %vm690_vm11, %v691_v20 }
 0x135   : > { %v545_v24 = vpop.permute.xlu1 %544 }
 0x137   : > { %682 = vmatpush.bf16.msk.msra.mxu2 %vm680_vm2, %v681_v26  ;;  %695 = vmatpush.bf16.msk.msra.mxu3 %vm693_vm0, %v694_v27 }
 0x13a   : > { %683 = vmatmul.msk.bf16.vlgmr.msra.gmra.mxu2 %vm501_vm10, %v703_v28  ;;  %696 = vmatmul.msk.bf16.vlgmr.msra.gmra.mxu3 %vm501_vm10, %v703_v28 }
 0x13d   : > { %v566_v43 = vpop.permute.xlu1 %565 }
 0x1bd   : > { %v521_v29 = vpop.f32.mrf.mxu2  ;;  %v535_v30 = vpop.f32.mrf.mxu3 }
 0x1be   : > { %v552_v31 = vmul.f32 %v545_v24, %v521_v29  ;;  %v553_v32 = vmul.f32 %v545_v24, %v535_v30 }
 0x1c0   : > { %v568_v34 = vadd.f32 %v561_v33, %v552_v31  ;;  %v569_v35 = vadd.f32 %v561_v33, %v553_v32 }
 0x1c2   : > { %v572_v36 = vmax.f32 %v568_v34, 0.0  ;;  %v573_v37 = vmax.f32 %v569_v35, 0.0 }
 0x1c4   : > { %576 = vst [vmem:[%s271_s18] sm:$0xff] %v572_v36 }
 0x1c5   : > { %577 = vst [vmem:[%s271_s18 + $0x8] sm:$0xff] %v573_v37  ;;  %v523_v39 = vpop.f32.mrf.mxu2  ;;  %v537_v40 = vpop.f32.mrf.mxu3 }
 0x1c6   : > { %v554_v41 = vmul.f32 %v550_v38, %v523_v39  ;;  %v555_v42 = vmul.f32 %v550_v38, %v537_v40 }
 0x1c8   : > { %v570_v44 = vadd.f32 %v566_v43, %v554_v41  ;;  %v571_v45 = vadd.f32 %v566_v43, %v555_v42 }
 0x1ca   : > { %v574_v46 = vmax.f32 %v570_v44, 0.0  ;;  %v575_v47 = vmax.f32 %v571_v45, 0.0 }
 0x1cc   : > { %578 = vst [vmem:[%s271_s18 + $0x10] sm:$0xff] %v574_v46 }
 0x1cd   : > { %579 = vst [vmem:[%s271_s18 + $0x18] sm:$0xff] %v575_v47 }
 0x1ce   : > { %825 = shalt.err (!%p822_p3)
}
 0x1cf   : > { %s872_s15 = smov 256  }
 0x1d0   : > { %705 = dma.vmem_to_hbm [thread:$0]  (%p951_p5), %s594_s22, 512, %s596_s23, %s581_s28, %s872_s15, %s872_s15, %s866_s13  }
 0x1d1 PF: > { %p711_p4 = scmp.ge.s32.totalorder %s860_s27, 2  ;;  %s610_s18 = sand.u32 1, %s848_s24  }
 0x1d2   : > { %s611_s20 = scalar_lea.sflag [#allocation3], %s610_s18 }
 0x1d3   : > { %p708_p7 = pnand %p711_p4, %p955_p6 }
 0x1d5   : > { %p709_p8 = pneg %p708_p7 }
 0x1d7   : > { %843 = dma.done.wait (%p709_p8), %s611_s20, 512  }
 0x1d8   : > { %845 = vsyncadd (%p709_p8), %s611_s20, 4294966784  ;;  %p17_p9 = scmp.ge.s32.totalorder %s938_s30, 4   ;;  %s1155_s24 = smov %s852_s25 }
 0x1d9   : > { %s1156_s25 = smov %s856_s26  ;;  %s1157_s26 = smov %s949_s10 }
 0x1da   : > { %s1158_s27 = smov %s938_s30  ;;  %19 = sbr.rel (!%p17_p9) target bundleno = 3 (0x3), region = 83 }
 0x1df   :  { %617 = vsyncpa [#allocation3], 1 }
 0x1e0   :  { %619 = vsyncpa [#allocation3 + $0x1], 1 }

</bundles_post_ra>
